<compile_context>
chip_gen: v5e
topology: v5e:2x2
jax: 0.10.0
libtpu: 0.0.40
codegen_flags: <defaults>
</compile_context>

<pallas_src>
import functools

import jax
import jax.numpy as jnp
from jax.experimental import pallas as pl
from jax.experimental.pallas import tpu as pltpu


def _round_up(a, b):
    return (a + b - 1) // b * b


def _vmem_capacity_bytes():
    """Per-TensorCore VMEM capacity for the attached TPU generation."""
    try:
        kind = jax.devices()[0].device_kind.lower()
    except Exception:
        return 64 << 20
    if "v7" in kind:
        return 64 << 20               # v7x: 64 MiB per TC
    if ("v5" in kind) or ("v6" in kind):
        return 128 << 20              # v5e / v5p / v6e: 128 MiB per TC
    return 64 << 20                   # conservative default for other generations


def _weight_tile_cap(E, esize):
    # Keep the double-buffered (E, tv) weight tile <= ~8 MiB.
    return max(128, ((8 << 20) // (2 * E * esize)) // 128 * 128)


def _pick_v_pad(V, tv_req, E, esize):
    """Padded vocab size. If V is already lane-aligned, never pad (no preds slice);
    otherwise a slice is unavoidable, so pad up to the requested tile for better DMA."""
    if V % 128 == 0:
        return V
    tv_eff = min(tv_req, _weight_tile_cap(E, esize), _round_up(V, 128))
    tv_eff = max(128, tv_eff // 128 * 128)
    return _round_up(V, tv_eff)


def _pick_vocab_tile(V_pad, tv_req, E, esize):
    """Largest multiple of 128 that divides V_pad and respects the weight-tile cap."""
    limit = max(128, min(tv_req, _weight_tile_cap(E, esize), V_pad) // 128 * 128)
    best = 128
    for cand in range(128, limit + 1, 128):
        if V_pad % cand == 0:
            best = cand
    return best


def mlm_kernel(x_ref, w_ref, b_ref, preds_ref, label_ref, m_run, i_run):
    # x_ref:     (TM, E)      row tile of token embeddings (compute dtype)
    # w_ref:     (E,  TV)     vocab tile of the transposed weight (compute dtype)
    # b_ref:     (1,  TV)     vocab tile of the bias (f32; finfo.min on padded columns)
    # preds_ref: (TM, TV)     logits output tile (lane-dense)
    # label_ref: (TM, 1)      argmax index, written once at the last vocab tile
    # m_run:     (TM, 1) f32  running max          (VMEM scratch, lives across vocab tiles)
    # i_run:     (TM, 1) i32  running argmax index (VMEM scratch)
    v = pl.program_id(1)

    @pl.when(v == 0)
    def _init():
        m_run[...] = jnp.full_like(m_run, -jnp.inf)
        i_run[...] = jnp.zeros_like(i_run)

    # MXU matmul with f32 accumulation, f32 bias add.
    logits = jnp.dot(x_ref[...], w_ref[...],
                     preferred_element_type=jnp.float32) + b_ref[...]
    preds_ref[...] = logits.astype(preds_ref.dtype)

    # Online argmax with torch.argmax first-occurrence tie-break:
    #   within a tile: min index among maxima; across tiles: strict '>' update.
    tv = logits.shape[-1]
    m_loc = jnp.max(logits, axis=-1, keepdims=True)                  # (TM, 1)
    col = jax.lax.broadcasted_iota(jnp.int32, (1, tv), 1)            # (1, TV) — broadcast, no full-tile iota
    cand = jnp.where(logits == m_loc, col, jnp.int32(tv))            # (TM, TV)
    i_loc = jnp.min(cand, axis=-1, keepdims=True) + v * tv           # (TM, 1) global ids

    better = m_loc > m_run[...]
    i_run[...] = jnp.where(better, i_loc, i_run[...])
    m_run[...] = jnp.where(better, m_loc, m_run[...])

    @pl.when(v == pl.num_programs(1) - 1)
    def _store():
        label_ref[...] = i_run[...]


def prepare_mlm_params(weight, bias, *, compute_dtype=jnp.bfloat16, tv=2048):
    """One-time parameter prep (done OUTSIDE the per-call forward).

    weight: torch layout (V, E); bias: (V,).
    Returns (weight_t_padded (E, V_pad) in compute_dtype, bias2d (1, V_pad) f32).
    Padded vocab columns get finfo.min bias so they can never win the argmax.
    """
    V, E = weight.shape
    esize = jnp.dtype(compute_dtype).itemsize
    V_pad = _pick_v_pad(V, tv, E, esize)
    w = jnp.asarray(weight).T.astype(compute_dtype)        # (E, V)
    b = jnp.asarray(bias).astype(jnp.float32)
    if V_pad > V:
        w = jnp.pad(w, ((0, 0), (0, V_pad - V)))
        b = jnp.pad(b, (0, V_pad - V),
                    constant_values=float(jnp.finfo(jnp.float32).min))
    return w, b.reshape(1, V_pad)


@functools.partial(jax.jit, static_argnames=("vocab_size", "tm", "tv", "preds_dtype"))
def mlm_forward(enc_output, weight_t, bias2d, *, vocab_size, tm=1024, tv=2048,
                preds_dtype=jnp.float32):
    """enc_output: (B, S, E); weight_t: (E, V_pad) pre-cast/pre-padded; bias2d: (1, V_pad)."""
    B, S, E = enc_output.shape
    E_w, V_pad = weight_t.shape
    assert E_w == E, "weight_t must be (embed_dim, V_pad)"
    V = vocab_size
    compute_dtype = weight_t.dtype
    esize = jnp.dtype(compute_dtype).itemsize
    psize = jnp.dtype(preds_dtype).itemsize
    M = B * S

    row_gran = 8 * max(1, 4 // esize)            # 8 rows (f32) / 16 rows (bf16) packing

    # Row tile: as large as requested (big tm minimizes weight re-streaming),
    # bounded by the row count and the sublane granularity.
    tm_eff = min(tm, _round_up(M, row_gran))
    tm_eff = max(row_gran, tm_eff // row_gran * row_gran)

    # Vocab tile: multiple of 128 that divides V_pad, capped by the weight-tile budget.
    tv_eff = _pick_vocab_tile(V_pad, tv, E, esize)

    # --- VMEM budgeting against the detected device capacity ---
    capacity = _vmem_capacity_bytes()
    budget = capacity - (8 << 20)                # Mosaic internal-scratch headroom

    def _tile_bytes(tm_):
        return (2 * tm_ * E * esize              # x tile (double-buffered)
                + 2 * E * tv_eff * esize         # weight tile (double-buffered)
                + 2 * tm_ * tv_eff * psize       # preds tile (double-buffered)
                + 2 * tv_eff * 4                 # bias tile
                + tm_ * 16)                      # labels + scratch

    while _tile_bytes(tm_eff) + (12 << 20) > budget and tm_eff > row_gran:
        tm_eff = max(row_gran, (tm_eff // 2) // row_gran * row_gran)
    M_pad = _round_up(M, tm_eff)

    # Keep >= 2 row tiles (when it adds no padding) so the "parallel" row axis can
    # actually be split across the two v7x TensorCores.
    if M_pad // tm_eff == 1 and M_pad // row_gran >= 2:
        half = ((M_pad // row_gran + 1) // 2) * row_gran
        if _round_up(M, half) == M_pad:
            tm_eff = half

    x = enc_output.reshape(M, E).astype(compute_dtype)
    if M_pad > M:
        x = jnp.pad(x, ((0, M_pad - M), (0, 0)))

    grid = (M_pad // tm_eff, V_pad // tv_eff)
    vmem_limit = int(max(min(_tile_bytes(tm_eff) + (16 << 20), budget),
                         min(32 << 20, budget)))

    preds_flat, labels_flat = pl.pallas_call(
        mlm_kernel,
        out_shape=(
            jax.ShapeDtypeStruct((M_pad, V_pad), preds_dtype),
            jax.ShapeDtypeStruct((M_pad, 1), jnp.int32),
        ),
        grid_spec=pltpu.PrefetchScalarGridSpec(
            num_scalar_prefetch=0,
            grid=grid,
            in_specs=[
                pl.BlockSpec((tm_eff, E), lambda i, v: (i, 0)),      # x row tile (reused over v; no re-DMA)
                pl.BlockSpec((E, tv_eff), lambda i, v: (0, v)),      # weight vocab tile
                pl.BlockSpec((1, tv_eff), lambda i, v: (0, v)),      # bias vocab tile
            ],
            out_specs=[
                pl.BlockSpec((tm_eff, tv_eff), lambda i, v: (i, v)),  # logits (lane-dense)
                pl.BlockSpec((tm_eff, 1), lambda i, v: (i, 0)),       # labels (written at last v)
            ],
            scratch_shapes=[
                pltpu.VMEM((tm_eff, 1), jnp.float32),   # running max
                pltpu.VMEM((tm_eff, 1), jnp.int32),     # running argmax index
            ],
        ),
        compiler_params=pltpu.CompilerParams(
            dimension_semantics=("parallel", "arbitrary"),
            vmem_limit_bytes=vmem_limit,
        ),
    )(x, weight_t, bias2d)

    # Avoid the extra full-array copy when there was no padding at all.
    if M_pad == M and V_pad == V:
        preds = preds_flat.reshape(B, S, V)
    else:
        preds = preds_flat[:M, :V].reshape(B, S, V)
    labels = labels_flat[:M, 0].reshape(B, S)   # int32; torch.argmax would be int64
    return preds, labels


def init_params(key, embed_dim, vocab_size):
    # Deterministic nn.Linear-style init: U(-1/sqrt(E), 1/sqrt(E)).
    kw, kb = jax.random.split(key)
    bound = 1.0 / (embed_dim ** 0.5)
    weight = jax.random.uniform(kw, (vocab_size, embed_dim), jnp.float32,
                                minval=-bound, maxval=bound)   # torch layout (V, E)
    bias = jax.random.uniform(kb, (vocab_size,), jnp.float32,
                              minval=-bound, maxval=bound)
    return weight, bias


if __name__ == "__main__":
    key = jax.random.PRNGKey(0)
    k_x, k_p, k_x2, k_p2 = jax.random.split(key, 4)

    # --- Test 1: small shape, f32 compute (faithful to the PyTorch f32 module) ---
    batch, seq, embed_dim, vocab_size = 2, 8, 32, 128
    enc_output = jax.random.normal(k_x, (batch, seq, embed_dim), jnp.float32)
    weight, bias = init_params(k_p, embed_dim, vocab_size)

    w_f32, b_f32 = prepare_mlm_params(weight, bias, compute_dtype=jnp.float32)
    preds, labels = mlm_forward(enc_output, w_f32, b_f32, vocab_size=vocab_size)
    jax.block_until_ready((preds, labels))

    ref_preds = enc_output @ weight.T + bias
    ref_labels = jnp.argmax(ref_preds, axis=-1).astype(jnp.int32)
    assert preds.shape == (batch, seq, vocab_size)
    assert labels.shape == (batch, seq)
    assert jnp.allclose(preds, ref_preds, atol=1e-4, rtol=1e-4)
    assert jnp.array_equal(labels, ref_labels)
    # Internal consistency: labels are the argmax of the logits the kernel emitted.
    assert jnp.array_equal(labels, jnp.argmax(preds, axis=-1).astype(jnp.int32))

    # --- Test 2: non-divisible vocab + padded vocab tiles (exercises padding and
    #             the cross-tile online argmax), still f32 ---
    b2_, s2_, e2_, v2_ = 2, 64, 64, 1000
    enc2 = jax.random.normal(k_x2, (b2_, s2_, e2_), jnp.float32)
    w2, bias2 = init_params(k_p2, e2_, v2_)
    w2_prep, b2_prep = prepare_mlm_params(w2, bias2, compute_dtype=jnp.float32)
    preds2, labels2 = mlm_forward(enc2, w2_prep, b2_prep, vocab_size=v2_, tm=128)
    jax.block_until_ready((preds2, labels2))
    ref2 = enc2 @ w2.T + bias2
    assert preds2.shape == (b2_, s2_, v2_)
    assert labels2.shape == (b2_, s2_)
    assert jnp.allclose(preds2, ref2, atol=1e-4, rtol=1e-4)
    assert jnp.array_equal(labels2, jnp.argmax(ref2, axis=-1).astype(jnp.int32))

    # --- Test 3: bf16 MXU operands (DEFAULT fast path; f32 accumulation) ---
    w_bf, b_bf = prepare_mlm_params(weight, bias)          # default compute_dtype=bf16
    preds_bf, labels_bf = mlm_forward(enc_output, w_bf, b_bf, vocab_size=vocab_size)
    jax.block_until_ready((preds_bf, labels_bf))
    assert jnp.allclose(preds_bf, ref_preds, atol=5e-2, rtol=5e-2)
    # Labels must be the argmax of the (bf16-matmul) logits the kernel itself produced.
    assert jnp.array_equal(labels_bf, jnp.argmax(preds_bf, axis=-1).astype(jnp.int32))

    print("KERNEL_OK")
</pallas_src>

<mosaic_0001>
module attributes {stable_mosaic.version = 11 : i64} {
  func.func @mlm_kernel(%arg0: i32, %arg1: i32, %arg2: memref<8x32xf32, #tpu.memory_space<vmem>>, %arg3: memref<32x128xf32, #tpu.memory_space<vmem>>, %arg4: memref<1x128xf32, #tpu.memory_space<vmem>>, %arg5: memref<8x128xf32, #tpu.memory_space<vmem>>, %arg6: memref<8x1xi32, #tpu.memory_space<vmem>>, %arg7: memref<8x1xf32, #tpu.memory_space<vmem>>, %arg8: memref<8x1xi32, #tpu.memory_space<vmem>>) attributes {dimension_semantics = [#tpu.dimension_semantics<parallel>, #tpu.dimension_semantics<arbitrary>], iteration_bounds = array<i64: 2, 1>, scalar_prefetch = 0 : i64, scratch_operands = 2 : i64, tpu.core_type = #tpu.core_type<tc>, window_params = [{transform_indices = @transform_0, window_bounds = array<i64: 8, 32>}, {transform_indices = @transform_1, window_bounds = array<i64: 32, 128>}, {transform_indices = @transform_2, window_bounds = array<i64: 1, 128>}, {transform_indices = @transform_3, window_bounds = array<i64: 8, 128>}, {transform_indices = @transform_4, window_bounds = array<i64: 8, 1>}]} {
    %c0_i32 = arith.constant 0 : i32
    %0 = arith.cmpi eq, %arg1, %c0_i32 : i32
    %1 = arith.extui %0 : i1 to i32
    %c0_i32_0 = arith.constant 0 : i32
    %2 = arith.cmpi ne, %1, %c0_i32_0 : i32
    scf.if %2 {
      %cst_23 = arith.constant 0xFF800000 : f32
      %35 = vector.broadcast %cst_23 : f32 to vector<8x1xf32>
      %c0_24 = arith.constant 0 : index
      %c0_25 = arith.constant 0 : index
      %36 = vector.load %arg7[%c0_24, %c0_25] : memref<8x1xf32, #tpu.memory_space<vmem>>, vector<8x1xf32>
      tpu.vector_store %arg7[%c0_24, %c0_25], %35 {strides = array<i32>} : memref<8x1xf32, #tpu.memory_space<vmem>>, vector<8x1xf32>,
      %c0_i32_26 = arith.constant 0 : i32
      %37 = vector.broadcast %c0_i32_26 : i32 to vector<8x1xi32>
      %c0_27 = arith.constant 0 : index
      %c0_28 = arith.constant 0 : index
      %38 = vector.load %arg8[%c0_27, %c0_28] : memref<8x1xi32, #tpu.memory_space<vmem>>, vector<8x1xi32>
      tpu.vector_store %arg8[%c0_27, %c0_28], %37 {strides = array<i32>} : memref<8x1xi32, #tpu.memory_space<vmem>>, vector<8x1xi32>,
    } else {
    }
    %c0 = arith.constant 0 : index
    %c0_1 = arith.constant 0 : index
    %3 = vector.load %arg2[%c0, %c0_1] : memref<8x32xf32, #tpu.memory_space<vmem>>, vector<8x32xf32>
    %c0_2 = arith.constant 0 : index
    %c0_3 = arith.constant 0 : index
    %4 = vector.load %arg3[%c0_2, %c0_3] : memref<32x128xf32, #tpu.memory_space<vmem>>, vector<32x128xf32>
    %cst = arith.constant dense<0.000000e+00> : vector<8x128xf32>
    %5 = tpu.matmul %3, %4, %cst {dimension_numbers = #tpu.dot_dimension_numbers<[1], [0], [0], [1], [0, 0, 1, 1], [], []>} : vector<8x32xf32>, vector<32x128xf32>, vector<8x128xf32> -> vector<8x128xf32>
    %c0_4 = arith.constant 0 : index
    %c0_5 = arith.constant 0 : index
    %6 = vector.load %arg4[%c0_4, %c0_5] : memref<1x128xf32, #tpu.memory_space<vmem>>, vector<1x128xf32>
    %7 = vector.broadcast %6 : vector<1x128xf32> to vector<8x128xf32>
    %8 = arith.addf %5, %7 : vector<8x128xf32>
    %c0_6 = arith.constant 0 : index
    %c0_7 = arith.constant 0 : index
    %9 = vector.load %arg5[%c0_6, %c0_7] : memref<8x128xf32, #tpu.memory_space<vmem>>, vector<8x128xf32>
    tpu.vector_store %arg5[%c0_6, %c0_7], %8 {strides = array<i32>} : memref<8x128xf32, #tpu.memory_space<vmem>>, vector<8x128xf32>,
    %cst_8 = arith.constant dense<0xFF800000> : vector<8xf32>
    %10 = vector.multi_reduction <maximumf>, %8, %cst_8 [1] : vector<8x128xf32> to vector<8xf32>
    %11 = vector.shape_cast %10 : vector<8xf32> to vector<8x1xf32>
    %12 = tpu.iota {dimensions = array<i32: 1>} : vector<1x128xi32>
    %13 = vector.broadcast %11 : vector<8x1xf32> to vector<8x128xf32>
    %14 = arith.cmpf oeq, %8, %13 : vector<8x128xf32>
    %c128_i32 = arith.constant 128 : i32
    %15 = vector.shape_cast %12 : vector<1x128xi32> to vector<1x128xi32>
    %16 = vector.broadcast %15 : vector<1x128xi32> to vector<8x128xi32>
    %17 = vector.broadcast %c128_i32 : i32 to vector<8x128xi32>
    %18 = arith.select %14, %16, %17 : vector<8x128xi1>, vector<8x128xi32>
    %cst_9 = arith.constant dense<2147483647> : vector<8xi32>
    %19 = vector.multi_reduction <minsi>, %18, %cst_9 [1] : vector<8x128xi32> to vector<8xi32>
    %20 = vector.shape_cast %19 : vector<8xi32> to vector<8x1xi32>
    %c128_i32_10 = arith.constant 128 : i32
    %21 = arith.muli %arg1, %c128_i32_10 : i32
    %22 = vector.broadcast %21 : i32 to vector<8x1xi32>
    %23 = arith.addi %20, %22 : vector<8x1xi32>
    %c0_11 = arith.constant 0 : index
    %c0_12 = arith.constant 0 : index
    %24 = vector.load %arg7[%c0_11, %c0_12] : memref<8x1xf32, #tpu.memory_space<vmem>>, vector<8x1xf32>
    %25 = arith.cmpf ogt, %11, %24 : vector<8x1xf32>
    %c0_13 = arith.constant 0 : index
    %c0_14 = arith.constant 0 : index
    %26 = vector.load %arg8[%c0_13, %c0_14] : memref<8x1xi32, #tpu.memory_space<vmem>>, vector<8x1xi32>
    %27 = arith.select %25, %23, %26 : vector<8x1xi1>, vector<8x1xi32>
    %c0_15 = arith.constant 0 : index
    %c0_16 = arith.constant 0 : index
    %28 = vector.load %arg8[%c0_15, %c0_16] : memref<8x1xi32, #tpu.memory_space<vmem>>, vector<8x1xi32>
    tpu.vector_store %arg8[%c0_15, %c0_16], %27 {strides = array<i32>} : memref<8x1xi32, #tpu.memory_space<vmem>>, vector<8x1xi32>,
    %c0_17 = arith.constant 0 : index
    %c0_18 = arith.constant 0 : index
    %29 = vector.load %arg7[%c0_17, %c0_18] : memref<8x1xf32, #tpu.memory_space<vmem>>, vector<8x1xf32>
    %30 = arith.select %25, %11, %29 : vector<8x1xi1>, vector<8x1xf32>
    %c0_19 = arith.constant 0 : index
    %c0_20 = arith.constant 0 : index
    %31 = vector.load %arg7[%c0_19, %c0_20] : memref<8x1xf32, #tpu.memory_space<vmem>>, vector<8x1xf32>
    tpu.vector_store %arg7[%c0_19, %c0_20], %30 {strides = array<i32>} : memref<8x1xf32, #tpu.memory_space<vmem>>, vector<8x1xf32>,
    %c0_i32_21 = arith.constant 0 : i32
    %32 = arith.cmpi eq, %arg1, %c0_i32_21 : i32
    %33 = arith.extui %32 : i1 to i32
    %c0_i32_22 = arith.constant 0 : i32
    %34 = arith.cmpi ne, %33, %c0_i32_22 : i32
    scf.if %34 {
      %c0_23 = arith.constant 0 : index
      %c0_24 = arith.constant 0 : index
      %35 = vector.load %arg8[%c0_23, %c0_24] : memref<8x1xi32, #tpu.memory_space<vmem>>, vector<8x1xi32>
      %c0_25 = arith.constant 0 : index
      %c0_26 = arith.constant 0 : index
      %36 = vector.load %arg6[%c0_25, %c0_26] : memref<8x1xi32, #tpu.memory_space<vmem>>, vector<8x1xi32>
      tpu.vector_store %arg6[%c0_25, %c0_26], %35 {strides = array<i32>} : memref<8x1xi32, #tpu.memory_space<vmem>>, vector<8x1xi32>,
    } else {
    }
    return
  }
  func.func @transform_0(%arg0: i32, %arg1: i32) -> (i32, i32) {
    %c0_i32 = arith.constant 0 : i32
    %c0_i32_0 = arith.constant 0 : i32
    return %arg0, %c0_i32 : i32, i32
  }
  func.func @transform_1(%arg0: i32, %arg1: i32) -> (i32, i32) {
    %c0_i32 = arith.constant 0 : i32
    %c0_i32_0 = arith.constant 0 : i32
    return %c0_i32, %arg1 : i32, i32
  }
  func.func @transform_2(%arg0: i32, %arg1: i32) -> (i32, i32) {
    %c0_i32 = arith.constant 0 : i32
    %c0_i32_0 = arith.constant 0 : i32
    return %c0_i32, %arg1 : i32, i32
  }
  func.func @transform_3(%arg0: i32, %arg1: i32) -> (i32, i32) {
    %c0_i32 = arith.constant 0 : i32
    return %arg0, %arg1 : i32, i32
  }
  func.func @transform_4(%arg0: i32, %arg1: i32) -> (i32, i32) {
    %c0_i32 = arith.constant 0 : i32
    %c0_i32_0 = arith.constant 0 : i32
    return %arg0, %c0_i32 : i32, i32
  }
}

</mosaic_0001>

<bundles_post_ra>
// kernel: squeeze.1
= control target key start
LH: loop header
LB: loop body
LE: loop exit
PB: predicated region body
PF: predicated region fallthrough
CT: control target
= control target key end

     0   :  { %s80_s0 = inlined_call_operand.vmem [shape: s32[16], index: 0, kind: input, shape index: {}]   ;;  %s81_s1 = inlined_call_operand.hbm [shape: s32[2,8], index: 1, kind: output, shape index: {}]  }
   0x1   :  { %v5_v0 = vld [vmem:[%s80_s0] sm:$0x1] }
   0x2   :  { %2 = vsyncpa [#allocation1], 0  ;;  %6 = vst [vmem:[#allocation3] sm:$0x1] %v5_v0  ;;  %vm8_vm0 = vcmask 64512   ;;  %s62_s0 = smov 120  }
   0x3   :  { %s63_s8 = smov [#allocation0]   ;;  %s27_s1 = sshll.u32 %s81_s1, 4  ;;  %s28_s1 = int_to_ptr.hbm [resolvable:$true] %s27_s1 }
   0x4   :  { %s25_s9 = sshll.u32 %s63_s8, 4  ;;  %s26_s9 = int_to_ptr.vmem [resolvable:$true] %s25_s9 }
   0x9   :  { %v10_v1 = vld [vmem:[#allocation3] sm:$0x1]  }
   0xa   :  { %v7_v2 = vld [vmem:[#allocation3] sm:$0x1]   ;;  %11 = vrot.lane.b32.xlu0 %v10_v1, %s62_s0 }
   0xb   :  { %9 = vst.msk [vmem:[#allocation2] sm:$0x1] %vm8_vm0, %v7_v2  }
  0x7c   :  { %v12_v3 = vpop.permute.xlu0 %11  }
  0x7d   :  { %15 = vst.msk [vmem:[#allocation2 + $0x1] sm:$0x1] %vm8_vm0, %v12_v3  }
  0x84   :  { %v18_v4 = vld [vmem:[#allocation2] sm:$0x3] }
  0x85   :  { %21 = vst [vmem:[#allocation0] sm:$0x3] %v18_v4 }
  0x86   :  { %30 = dma.vmem_to_hbm [thread:$0]  %s26_s9, 32, %s28_s1, [#allocation1]  }
  0x87   :  { %60 = dma.done.wait [#allocation1], 32  }
  0x88   :  { %61 = vsyncadd [#allocation1], 4294967264 }
  0x89   :  { %33 = vsyncpa [#allocation1], 1 }

// kernel: mlm_forward.1
= control target key start
LH: loop header
LB: loop body
LE: loop exit
PB: predicated region body
PF: predicated region fallthrough
CT: control target
= control target key end

     0   :  { %10 = vsyncpa [#allocation5], 0  ;;  %s939_s0 = inlined_call_operand.hbm [shape: f32[16,32], index: 0, kind: input, shape index: {}]   ;;  %s940_s1 = inlined_call_operand.hbm [shape: f32[32,128], index: 1, kind: input, shape index: {}]   ;;  %s941_s2 = inlined_call_operand.vmem [shape: f32[1,128], index: 2, kind: input, shape index: {}]   ;;  %s942_s3 = inlined_call_operand.hbm [shape: f32[16,128], index: 3, kind: output, shape index: {0}]   ;;  %s943_s4 = inlined_call_operand.vmem [shape: s32[16,1], index: 4, kind: output, shape index: {1}]  }
   0x1   :  { %12 = vsyncpa [#allocation5 + $0x1], 0 }
   0x2   :  { %13 = vsyncpa [#allocation8], 0 }
   0x3   :  { %14 = vsyncpa [#allocation6], 0 }
   0x4   :  { %16 = vsyncpa [#allocation6 + $0x1], 0  ;;  %s781_s15 = smov 0   ;;  %s783_s16 = smov 0  }
   0x5   :  { %s785_s17 = smov 0   ;;  %s787_s18 = smov 0  }
   0x6   :  { %s789_s19 = smov 0   ;;  %s791_s20 = smov 0  }
   0x7 LB: > { %s507_s21 = sadd.s32 4294967295, %s749_s20   ;;  %p509_p0 = scmp.ge.s32.totalorder %s749_s20, 1  ;;  %s749_s20 = sphi %s791_s20, %s22_s20   ;;  %s745_s19 = sphi %s789_s19, %s954_s19   ;;  %s741_s18 = sphi %s787_s18, %s953_s18   ;;  %s737_s17 = sphi %s785_s17, %s952_s17   ;;  %s733_s16 = sphi %s783_s16, %s951_s16   ;;  %s729_s15 = sphi %s781_s15, %s950_s15  }
   0x8   : > { %p813_p1 = scmp.eq.s32.totalorder %s507_s21, 0  ;;  %p171_p2 = scmp.lt.s32.totalorder %s749_s20, 3 }
   0x9   : > { %s184_s25 = sshll.u32 %s940_s1, 4  ;;  %s751_s27 = smov [#allocation7]   ;;  %s185_s25 = int_to_ptr.hbm [resolvable:$true] %s184_s25 }
   0xa   : > { %p821_p3 = pnand %p509_p0, %p171_p2  ;;  %s186_s28 = sshll.u32 %s751_s27, 4  ;;  %s187_s28 = int_to_ptr.vmem [resolvable:$true] %s186_s28 }
   0xb   : > { %p512_p6 = scmp.ge.s32.totalorder %s749_s20, 2  ;;  %s752_s29 = smov 128  }
   0xc   : > { %p533_p4 = pneg %p821_p3  ;;  %s753_s30 = smov 8  }
   0xd   : > { %s508_s5 = sadd.s32 4294967294, %s749_s20   ;;  %s34_s6 = sadd.s32 1, %s745_s19 }
   0xe   : > { %p534_p5 = pnand %p533_p4, %p813_p1  ;;  %s41_s7 = sadd.s32 1, %s737_s17 }
   0xf   : > { %p36_p7 = scmp.ge.s32.totalorder %s34_s6, 2  ;;  %p48_p8 = scmp.ne.s32.totalorder %s737_s17, %s733_s16 }
  0x10   : > { %536 = dma.hbm_to_vmem [thread:$0]  (!%p534_p5), %s185_s25, 512, %s187_s28, [#allocation8], %s752_s29, %s752_s29, %s753_s30  }
  0x11   : > { %p49_p9 = scmp.eq.s32.totalorder %s749_s20, 0  ;;  %p54_p10 = scmp.ne.s32.totalorder %s733_s16, %s729_s15 }
  0x12   : > { %s956_s6 = smov (%p36_p7, %s34_s6), 0  ;;  %p132_p13 = scmp.eq.s32.totalorder %s507_s21, 1 }
  0x13   : > { %p840_p11 = por %p49_p9, %p48_p8  ;;  %p846_p12 = por %p813_p1, %p54_p10 }
  0x14   : > { %s38_s10 = ssub.s32 %s745_s19, %s956_s6  ;;  %p138_p2 = scmp.eq.s32.totalorder %s508_s5, 1 }
  0x15   : > { %p39_p0 = scmp.eq.s32.totalorder %s38_s10, 0  ;;  %p852_p4 = por %p132_p13, %p48_p8 }
  0x16   : > { %p546_p5 = scmp.lt.s32.totalorder %s749_s20, 2  ;;  %p860_p7 = por %p138_p2, %p54_p10 }
  0x17   : > { %s858_s12 = scalar_select %p39_p0, %s737_s17, %s41_s7  }
  0x18   : > { %s206_s14 = sand.u32 1, %s737_s17   ;;  %s514_s24 = sshll.u32 %s745_s19, 3 }
  0x19   : > { %s513_s23 = sshll.u32 %s206_s14, 3  ;;  %s214_s21 = scalar_lea.hbm %s939_s0, %s514_s24 }
  0x1a   : > { %s210_s28 = scalar_lea.vmem [#allocation4], %s513_s23  ;;  %s216_s30 = sshll.u32 %s214_s21, 4  ;;  %s217_s30 = int_to_ptr.hbm [resolvable:$true] %s216_s30 }
  0x1b   : > { %s218_s29 = sshll.u32 %s210_s28, 4  ;;  %p538_p8 = pnand %p546_p5, %p840_p11  ;;  %s219_s29 = int_to_ptr.vmem [resolvable:$true] %s218_s29 }
  0x1c   : > { %s207_s5 = scalar_lea.sflag [#allocation5], %s206_s14  ;;  %227 = sbr.rel (%p821_p3) target bundleno = 542 (0x21e), region = 32 }
  0x1d   : > { %540 = dma.hbm_to_vmem [thread:$0]  (!%p538_p8), %s217_s30, 128, %s219_s29, %s207_s5  }
  0x1e   : > { %s874_s7 = sand.u32 (!%p821_p3), 1, %s733_s16  }
  0x1f   : > { %s516_s10 = sshll.u32 (!%p821_p3), %s874_s7, 3  ;;  %s230_s24 = scalar_lea.sflag (!%p821_p3), [#allocation5], %s874_s7 }
  0x20   : > { %s233_s23 = scalar_lea.vmem (!%p821_p3), [#allocation4], %s516_s10 }
  0x21   : > { %716 = dma.done.wait (%p846_p12), %s230_s24, 128  }
  0x22   : > { %718 = vsyncadd (%p846_p12), %s230_s24, 4294967168 }
  0x23   : > { %720 = dma.done.wait (%p813_p1), [#allocation8], 512  }
  0x24   : > { %722 = vsyncadd (%p813_p1), [#allocation8], 4294966784  ;;  %v289_v0 = vld [vmem:[#allocation7 + $0x18] sm:$0xff]  ;;  %v288_v1 = vld [vmem:[#allocation7 + $0x10] sm:$0xff]  ;;  %vm294_vm0 = vcmask 261120   ;;  %vm282_vm1 = vcmask 7168   ;;  %v321_v9 = vlaneseq }
  0x25   : > { %310 = vmatpush.msra.mxu0 %v289_v0  ;;  %v287_v2 = vld [vmem:[#allocation7 + $0x8] sm:$0xff]  ;;  %v286_v3 = vld [vmem:[#allocation7] sm:$0xff]  ;;  %v285_v4 = vld [vmem:[%s233_s23] sm:$0xff]  ;;  %v754_v5 = vmov -inf   ;;  %s264_s22 = scalar_lea.vmem [#allocation9], %s516_s10  ;;  %v755_v17 = vmov 0  }
  0x26   : > { %283 = vst.msk [vmem:[#allocation2] sm:$0xff] %vm282_vm1, %v754_v5  ;;  %v602_v6 = vld [vmem:[%s941_s2] ss:$0 sm:$0xff]  ;;  %v322_v11 = vand.u32 127, %v321_v9  ;;  %s522_s9 = sshll.u32 %s741_s18, 3  ;;  %s374_s21 = sshll.u32 %s264_s22, 4  ;;  %s375_s21 = int_to_ptr.vmem [resolvable:$true] %s374_s21 }
  0x27   : > { %311 = vmatpush.msra.mxu0 %v288_v1  ;;  %284 = vst.msk [vmem:[#allocation3] sm:$0xff] %vm282_vm1, %v755_v17  ;;  %s372_s27 = scalar_lea.hbm %s942_s3, %s522_s9  ;;  %s357_s29 = scalar_lea.sflag [#allocation6], %s874_s7 }
  0x28   : > { %s376_s28 = sshll.u32 %s372_s27, 4  ;;  %s683_s23 = scalar_lea.hbm %s942_s3, 16  ;;  %s377_s28 = int_to_ptr.hbm [resolvable:$true] %s376_s28 }
  0x29   : > { %312 = vmatpush.msra.mxu0 %v287_v2  ;;  %s677_s30 = sshra.s32 %s377_s28, 4  ;;  %s678_s30 = int_to_ptr.hbm [resolvable:$true] %s677_s30 }
  0x2a   : > { %s679_s5 = scalar_lea.hbm %s678_s30, 8  ;;  %p684_p10 = scmp.lt.s32.totalorder %s678_s30, %s942_s3 }
  0x2b   : > { %313 = vmatpush.msra.mxu0 %v286_v3  ;;  %p680_p1 = scmp.ne.s32.totalorder %s678_s30, %s679_s5  ;;  %p685_p11 = scmp.lt.s32.totalorder %s683_s23, %s679_s5 }
  0x2c   : > { %520 = vmatmul.msk.f32.vlgmr.msra.gmra.mxu0 %vm294_vm0, %v285_v4 }
  0x2d   : > { %v342_v10 = vld [vmem:[#allocation2] sm:$0xff]  ;;  %p681_p3 = pnand %p680_p1, %p852_p4  ;;  %p686_p12 = por %p685_p11, %p684_p10 }
  0x2f   : > { %p682_p9 = pneg %p681_p3 }
  0x31   : > { %p687_p13 = pnand %p686_p12, %p682_p9 }
  0xa9   : > { %v315_v7 = vpop.f32.mrf.mxu0 }
  0xaa   : > { %v316_v8 = vadd.f32 %v602_v6, %v315_v7 }
  0xac   : > { %318 = vst [vmem:[%s264_s22] sm:$0xff] %v316_v8  ;;  %319 = vmax.xlane.f32.xlu0 %v316_v8 }
 0x11f   : > { %v320_v12 = vpop.xlane.xlu0 %319 }
 0x120   : > { %vm323_vm2 = vcmp.eq.f32.partialorder %v316_v8, %v320_v12  ;;  %vm343_vm3 = vcmp.gt.f32.partialorder %v320_v12, %v342_v10 }
 0x121   : > { %v349_v13 = vsel %vm343_vm3, %v320_v12, %v342_v10  ;;  %v324_v14 = vsel %vm323_vm2, %v322_v11, 128 }
 0x122   : > { %350 = vst.msk [vmem:[#allocation2] sm:$0xff] %vm282_vm1, %v349_v13  ;;  %v326_v15 = vshra.s32 %v324_v14, 16  ;;  %v325_v18 = vand.u32 65535, %v324_v14 }
 0x124   : > { %v328_v16 = vcvt.s32.f32 %v326_v15  ;;  %v327_v20 = vcvt.s32.f32 %v325_v18 }
 0x126   : > { %329 = vmin.xlane.f32.xlu0 %v328_v16 }
 0x199   : > { %v330_v19 = vpop.xlane.xlu0 %329 }
 0x19a   : > { %vm331_vm4 = vcmp.eq.f32.partialorder %v328_v16, %v330_v19 }
 0x19b   : > { %v332_v21 = vsel %vm331_vm4, %v327_v20, inf }
 0x19c   : > { %333 = vmin.xlane.f32.xlu1 %v332_v21 }
 0x19d   : > { %690 = shalt.err (!%p687_p13)
}
 0x19e   : > { %531 = dma.vmem_to_hbm [thread:$0]  (%p852_p4), %s375_s21, 128, %s377_s28, %s357_s29   ;;  %v336_v22 = vcvt.f32.s32 %v330_v19  ;;  %v344_v26 = vld [vmem:[#allocation3] sm:$0xff] }
 0x19f   : > { %p274_p0 = scmp.lt.s32.totalorder %s741_s18, 1 }
 0x1a0   : > { %v337_v24 = vshll.u32 %v336_v22, 16 }
 0x1a1   : > { %s958_s18 = smov (!%p274_p0, %s741_s18), 1 }
 0x1a2   : > { %s519_s7 = sshll.u32 %s958_s18, 3 }
 0x1a3   : > { %s277_s11 = scalar_lea.vmem %s943_s4, %s519_s7 }
 0x20f   : > { %v334_v23 = vpop.xlane.xlu1 %333 }
 0x210   : > { %v335_v25 = vcvt.f32.s32 %v334_v23 }
 0x212   : > { %v338_v27 = vadd.s32 %v337_v24, %v335_v25 }
 0x214   : > { %v345_v28 = vsel %vm343_vm3, %v338_v27, %v344_v26 }
 0x215   : > { %347 = vst.msk [vmem:[#allocation3] sm:$0xff] %vm282_vm1, %v345_v28 }
 0x21c   : > { %v354_v29 = vld [vmem:[#allocation3] sm:$0xff] }
 0x21d   : > { %355 = vst.msk [vmem:[%s277_s11] sm:$0xff] %vm282_vm1, %v354_v29 }
 0x21e PF: > { %s391_s14 = sand.u32 1, %s729_s15   ;;  %p542_p2 = pnand %p512_p6, %p860_p7 }
 0x21f   : > { %s392_s25 = scalar_lea.sflag [#allocation6], %s391_s14 }
 0x220   : > { %p543_p4 = pneg %p542_p2 }
 0x222   : > { %724 = dma.done.wait (%p543_p4), %s392_s25, 128  }
 0x223   : > { %726 = vsyncadd (%p543_p4), %s392_s25, 4294967168  ;;  %s22_s20 = sadd.s32 1, %s749_s20   ;;  %s950_s15 = smov %s733_s16 }
 0x224   : > { %p19_p5 = scmp.ge.s32.totalorder %s22_s20, 4   ;;  %s951_s16 = smov %s737_s17 }
 0x225   : > { %s952_s17 = smov %s858_s12  ;;  %s953_s18 = smov %s745_s19 }
 0x226   : > { %s954_s19 = smov %s956_s6  ;;  %21 = sbr.rel (!%p19_p5) target bundleno = 7 (0x7), region = 105 }
 0x22b   :  { %405 = vsyncpa [#allocation5], 1 }
 0x22c   :  { %407 = vsyncpa [#allocation5 + $0x1], 1 }
 0x22d   :  { %408 = vsyncpa [#allocation8], 1 }
 0x22e   :  { %409 = vsyncpa [#allocation6], 1 }
 0x22f   :  { %411 = vsyncpa [#allocation6 + $0x1], 1 }

</bundles_post_ra>
